<compile_context>
chip_gen: v7x
topology: tpu7x:2x2x1
jax: 0.10.0
libtpu: 0.0.40
codegen_flags: <defaults>
</compile_context>

<pallas_src>
import jax
import jax.numpy as jnp
import numpy as np
from jax.experimental import pallas as pl
from jax.experimental.pallas import tpu as pltpu

KSIZE = 5
PAD = (KSIZE - 1) // 2


def _gaussian_taps_1d(ksize=KSIZE, sigma=None):
    """1-D taps g such that outer(g, g) equals the module's normalized 2-D weight."""
    if sigma is None:
        sigma = 0.3 * ((ksize - 1) / 2.0 - 1) + 0.8
    c = ksize // 2
    g = np.exp(-((np.arange(ksize, dtype=np.float64) - c) ** 2) / (2.0 * sigma ** 2))
    return g / g.sum()


def _band_reflect_matrix(n, taps=None):
    """Banded matrix A (n x n) s.t. (A @ x)[i] = sum_j taps[j] * x[reflect(i+j-PAD)],
    with PyTorch 'reflect' boundary semantics (-1 -> 1, -2 -> 2, n -> n-2, n+1 -> n-3)."""
    if taps is None:
        taps = _gaussian_taps_1d()
    A = np.zeros((n, n), dtype=np.float64)
    for i in range(n):
        for j, t in enumerate(taps):
            k = i + j - PAD
            if k < 0:
                k = -k
            elif k >= n:
                k = 2 * (n - 1) - k
            A[i, k] += t
    return A.astype(np.float32)


# --------------------------------------------------------------------------- #
# Kernel
# --------------------------------------------------------------------------- #
def _gauss_kernel(ah_ref, awt_ref, x_ref, o_ref):
    # ah_ref : (H, H) f32 — vertical banded reflect matrix
    # awt_ref: (W, W) f32 — horizontal banded reflect matrix, transposed
    # x_ref  : (B, H, W)  input planes (VMEM block)
    # o_ref  : (B, H, W)  output planes
    ah = ah_ref[...]
    awt = awt_ref[...]
    nb = x_ref.shape[0]
    for b in range(nb):                                   # static unroll over planes
        xb = x_ref[b].astype(jnp.float32)                 # (H, W) dense load
        vb = jnp.dot(ah, xb, preferred_element_type=jnp.float32)   # vertical pass (MXU)
        ob = jnp.dot(vb, awt, preferred_element_type=jnp.float32)  # horizontal pass (MXU)
        o_ref[b] = ob.astype(o_ref.dtype)                 # dense, lane-aligned store


# --------------------------------------------------------------------------- #
# Generation-aware sizing
# --------------------------------------------------------------------------- #
def _device_info():
    """Returns (physical VMEM bytes, #TensorCores sharing the device)."""
    vmem_cap = 64 << 20                      # conservative default = v7x per-TC VMEM
    try:
        vmem_cap = int(pltpu.get_tpu_info().vmem_capacity_bytes)
    except Exception:
        pass
    n_cores = 2                              # conservative: assume megacore-style device
    try:
        kind = jax.devices()[0].device_kind.lower()
        if any(t in kind for t in ("v2", "v3", "v5e", "v5 lite", "v5lite",
                                   "v6e", "v6 lite", "v6lite")):
            n_cores = 1                      # single TensorCore per device
    except Exception:
        pass
    return vmem_cap, n_cores


def _plane_batch(n_planes, H, W, elt, budget, keep_parallel):
    """Planes per grid step: largest divisor of n_planes that fits `budget`.
    On multi-TensorCore devices keep >= 2 blocks on the 'parallel' axis."""
    # double-buffered in + out blocks plus ~3 live f32 intermediates per plane
    per_plane = 4 * H * W * elt + 3 * H * W * 4
    best = 1
    for b in range(1, n_planes + 1):
        if n_planes % b:
            continue
        if b * per_plane > budget:
            break
        if keep_parallel and n_planes >= 2 and n_planes // b < 2:
            break
        best = b
    return best, per_plane


# --------------------------------------------------------------------------- #
# Wrapper
# --------------------------------------------------------------------------- #
def gaussian_filter(x):
    """x: (N, 3, H, W). Depthwise 5x5 Gaussian blur, reflect padding, stride 1
    (same semantics as the PyTorch GaussianFilter module)."""
    N, C, H, W = x.shape
    assert H > PAD and W > PAD, "reflect padding requires H, W > 2"
    n_planes = N * C
    xr = x.reshape(n_planes, H, W)                       # merge leading dims (free)
    elt = x.dtype.itemsize

    ah = jnp.asarray(_band_reflect_matrix(H))            # (H, H)
    awt = jnp.asarray(_band_reflect_matrix(W).T)         # (W, W)

    vmem_cap, n_cores = _device_info()
    budget = min(vmem_cap // 4, 24 << 20)                # per-step working-set budget
    B, per_plane = _plane_batch(n_planes, H, W, elt, budget,
                                keep_parallel=(n_cores > 1))
    fixed = 4 * (H * H + W * W) * 4                      # double-buffered band matrices
    vmem_limit = int(min(vmem_cap * 3 // 4,
                         max(32 << 20, 2 * (B * per_plane + fixed))))

    cost = pl.CostEstimate(
        flops=int(2 * n_planes * H * W * (H + W)),
        transcendentals=0,
        bytes_accessed=int(2 * n_planes * H * W * elt + (H * H + W * W) * 4),
    )

    out = pl.pallas_call(
        _gauss_kernel,
        out_shape=jax.ShapeDtypeStruct((n_planes, H, W), x.dtype),
        grid_spec=pltpu.PrefetchScalarGridSpec(
            num_scalar_prefetch=0,
            grid=(n_planes // B,),
            in_specs=[
                pl.BlockSpec((H, H), lambda i: (0, 0)),          # A_H   (resident)
                pl.BlockSpec((W, W), lambda i: (0, 0)),          # A_W^T (resident)
                pl.BlockSpec((B, H, W), lambda i: (i, 0, 0)),    # input planes
            ],
            out_specs=pl.BlockSpec((B, H, W), lambda i: (i, 0, 0)),
        ),
        compiler_params=pltpu.CompilerParams(
            dimension_semantics=("parallel",),
            vmem_limit_bytes=vmem_limit,
        ),
        cost_estimate=cost,
    )(ah, awt, xr)
    return out.reshape(N, C, H, W)


# --------------------------------------------------------------------------- #
# Plain-JAX reference (matches the PyTorch module exactly)
# --------------------------------------------------------------------------- #
def _gaussian_weight_2d(ksize=KSIZE, sigma=None):
    if sigma is None:
        sigma = 0.3 * ((ksize - 1) / 2.0 - 1) + 0.8
    coord = np.arange(ksize)
    x_grid = np.tile(coord, ksize).reshape(ksize, ksize)
    y_grid = x_grid.T
    xy = np.stack([x_grid, y_grid], axis=-1).astype(np.float32)
    center = ksize // 2
    w = np.exp(-np.sum((xy - center) ** 2.0, axis=-1) / (2.0 * sigma ** 2))
    w /= np.sum(w)
    return jnp.asarray(w, dtype=jnp.float32)


def _reference(x):
    N, C, H, W = x.shape
    weight = _gaussian_weight_2d()
    xp = jnp.pad(x, ((0, 0), (0, 0), (PAD, PAD), (PAD, PAD)), mode="reflect")
    w = jnp.broadcast_to(weight[None, None], (C, 1, KSIZE, KSIZE))
    return jax.lax.conv_general_dilated(
        xp, w, window_strides=(1, 1), padding="VALID",
        dimension_numbers=("NCHW", "OIHW", "NCHW"),
        feature_group_count=C,
    )


if __name__ == "__main__":
    key = jax.random.PRNGKey(0)
    N, C, H, W = 2, 3, 16, 16   # module's conv is fixed to 3 channels
    x = jax.random.uniform(key, (N, C, H, W), dtype=jnp.float32)

    y = jax.block_until_ready(jax.jit(gaussian_filter)(x))
    y_ref = jax.block_until_ready(_reference(x))

    np.testing.assert_allclose(np.asarray(y), np.asarray(y_ref), rtol=1e-5, atol=1e-5)
    print("KERNEL_OK")
</pallas_src>

<mosaic_0001>
module attributes {stable_mosaic.version = 11 : i64} {
  func.func @_gauss_kernel(%arg0: i32, %arg1: memref<16x16xf32, #tpu.memory_space<vmem>>, %arg2: memref<16x16xf32, #tpu.memory_space<vmem>>, %arg3: memref<3x16x16xf32, #tpu.memory_space<vmem>>, %arg4: memref<3x16x16xf32, #tpu.memory_space<vmem>>) attributes {dimension_semantics = [#tpu.dimension_semantics<parallel>], iteration_bounds = array<i64: 2>, scalar_prefetch = 0 : i64, scratch_operands = 0 : i64, tpu.core_type = #tpu.core_type<tc>, window_params = [{pipeline_mode = #tpu.pipeline_mode<synchronous>, transform_indices = @transform_0, window_bounds = array<i64: 16, 16>}, {pipeline_mode = #tpu.pipeline_mode<synchronous>, transform_indices = @transform_1, window_bounds = array<i64: 16, 16>}, {transform_indices = @transform_2, window_bounds = array<i64: 3, 16, 16>}, {transform_indices = @transform_3, window_bounds = array<i64: 3, 16, 16>}]} {
    %c0 = arith.constant 0 : index
    %c0_0 = arith.constant 0 : index
    %0 = vector.load %arg1[%c0, %c0_0] : memref<16x16xf32, #tpu.memory_space<vmem>>, vector<16x16xf32>
    %c0_1 = arith.constant 0 : index
    %c0_2 = arith.constant 0 : index
    %1 = vector.load %arg2[%c0_1, %c0_2] : memref<16x16xf32, #tpu.memory_space<vmem>>, vector<16x16xf32>
    %c0_3 = arith.constant 0 : index
    %c0_4 = arith.constant 0 : index
    %c0_5 = arith.constant 0 : index
    %2 = vector.load %arg3[%c0_3, %c0_4, %c0_5] : memref<3x16x16xf32, #tpu.memory_space<vmem>>, vector<1x16x16xf32>
    %3 = vector.shape_cast %2 : vector<1x16x16xf32> to vector<16x16xf32>
    %cst = arith.constant dense<0.000000e+00> : vector<16x16xf32>
    %4 = tpu.matmul %0, %3, %cst {dimension_numbers = #tpu.dot_dimension_numbers<[1], [0], [0], [1], [0, 0, 1, 1], [], []>} : vector<16x16xf32>, vector<16x16xf32>, vector<16x16xf32> -> vector<16x16xf32>
    %cst_6 = arith.constant dense<0.000000e+00> : vector<16x16xf32>
    %5 = tpu.matmul %4, %1, %cst_6 {dimension_numbers = #tpu.dot_dimension_numbers<[1], [0], [0], [1], [0, 0, 1, 1], [], []>} : vector<16x16xf32>, vector<16x16xf32>, vector<16x16xf32> -> vector<16x16xf32>
    %c0_7 = arith.constant 0 : index
    %c0_8 = arith.constant 0 : index
    %c0_9 = arith.constant 0 : index
    %6 = vector.load %arg4[%c0_7, %c0_8, %c0_9] : memref<3x16x16xf32, #tpu.memory_space<vmem>>, vector<1x16x16xf32>
    %7 = vector.shape_cast %6 : vector<1x16x16xf32> to vector<16x16xf32>
    %8 = vector.shape_cast %5 : vector<16x16xf32> to vector<1x16x16xf32>
    tpu.vector_store %arg4[%c0_7, %c0_8, %c0_9], %8 {strides = array<i32>} : memref<3x16x16xf32, #tpu.memory_space<vmem>>, vector<1x16x16xf32>,
    %c1 = arith.constant 1 : index
    %c0_10 = arith.constant 0 : index
    %c0_11 = arith.constant 0 : index
    %9 = vector.load %arg3[%c1, %c0_10, %c0_11] : memref<3x16x16xf32, #tpu.memory_space<vmem>>, vector<1x16x16xf32>
    %10 = vector.shape_cast %9 : vector<1x16x16xf32> to vector<16x16xf32>
    %cst_12 = arith.constant dense<0.000000e+00> : vector<16x16xf32>
    %11 = tpu.matmul %0, %10, %cst_12 {dimension_numbers = #tpu.dot_dimension_numbers<[1], [0], [0], [1], [0, 0, 1, 1], [], []>} : vector<16x16xf32>, vector<16x16xf32>, vector<16x16xf32> -> vector<16x16xf32>
    %cst_13 = arith.constant dense<0.000000e+00> : vector<16x16xf32>
    %12 = tpu.matmul %11, %1, %cst_13 {dimension_numbers = #tpu.dot_dimension_numbers<[1], [0], [0], [1], [0, 0, 1, 1], [], []>} : vector<16x16xf32>, vector<16x16xf32>, vector<16x16xf32> -> vector<16x16xf32>
    %c1_14 = arith.constant 1 : index
    %c0_15 = arith.constant 0 : index
    %c0_16 = arith.constant 0 : index
    %13 = vector.load %arg4[%c1_14, %c0_15, %c0_16] : memref<3x16x16xf32, #tpu.memory_space<vmem>>, vector<1x16x16xf32>
    %14 = vector.shape_cast %13 : vector<1x16x16xf32> to vector<16x16xf32>
    %15 = vector.shape_cast %12 : vector<16x16xf32> to vector<1x16x16xf32>
    tpu.vector_store %arg4[%c1_14, %c0_15, %c0_16], %15 {strides = array<i32>} : memref<3x16x16xf32, #tpu.memory_space<vmem>>, vector<1x16x16xf32>,
    %c2 = arith.constant 2 : index
    %c0_17 = arith.constant 0 : index
    %c0_18 = arith.constant 0 : index
    %16 = vector.load %arg3[%c2, %c0_17, %c0_18] : memref<3x16x16xf32, #tpu.memory_space<vmem>>, vector<1x16x16xf32>
    %17 = vector.shape_cast %16 : vector<1x16x16xf32> to vector<16x16xf32>
    %cst_19 = arith.constant dense<0.000000e+00> : vector<16x16xf32>
    %18 = tpu.matmul %0, %17, %cst_19 {dimension_numbers = #tpu.dot_dimension_numbers<[1], [0], [0], [1], [0, 0, 1, 1], [], []>} : vector<16x16xf32>, vector<16x16xf32>, vector<16x16xf32> -> vector<16x16xf32>
    %cst_20 = arith.constant dense<0.000000e+00> : vector<16x16xf32>
    %19 = tpu.matmul %18, %1, %cst_20 {dimension_numbers = #tpu.dot_dimension_numbers<[1], [0], [0], [1], [0, 0, 1, 1], [], []>} : vector<16x16xf32>, vector<16x16xf32>, vector<16x16xf32> -> vector<16x16xf32>
    %c2_21 = arith.constant 2 : index
    %c0_22 = arith.constant 0 : index
    %c0_23 = arith.constant 0 : index
    %20 = vector.load %arg4[%c2_21, %c0_22, %c0_23] : memref<3x16x16xf32, #tpu.memory_space<vmem>>, vector<1x16x16xf32>
    %21 = vector.shape_cast %20 : vector<1x16x16xf32> to vector<16x16xf32>
    %22 = vector.shape_cast %19 : vector<16x16xf32> to vector<1x16x16xf32>
    tpu.vector_store %arg4[%c2_21, %c0_22, %c0_23], %22 {strides = array<i32>} : memref<3x16x16xf32, #tpu.memory_space<vmem>>, vector<1x16x16xf32>,
    return
  }
  func.func @transform_0(%arg0: i32) -> (i32, i32) {
    %c0_i32 = arith.constant 0 : i32
    %c0_i32_0 = arith.constant 0 : i32
    %c0_i32_1 = arith.constant 0 : i32
    return %c0_i32, %c0_i32_0 : i32, i32
  }
  func.func @transform_1(%arg0: i32) -> (i32, i32) {
    %c0_i32 = arith.constant 0 : i32
    %c0_i32_0 = arith.constant 0 : i32
    %c0_i32_1 = arith.constant 0 : i32
    return %c0_i32, %c0_i32_0 : i32, i32
  }
  func.func @transform_2(%arg0: i32) -> (i32, i32, i32) {
    %c0_i32 = arith.constant 0 : i32
    %c0_i32_0 = arith.constant 0 : i32
    %c0_i32_1 = arith.constant 0 : i32
    return %arg0, %c0_i32, %c0_i32_0 : i32, i32, i32
  }
  func.func @transform_3(%arg0: i32) -> (i32, i32, i32) {
    %c0_i32 = arith.constant 0 : i32
    %c0_i32_0 = arith.constant 0 : i32
    %c0_i32_1 = arith.constant 0 : i32
    return %arg0, %c0_i32, %c0_i32_0 : i32, i32, i32
  }
}

</mosaic_0001>

<bundles_post_ra>
// kernel: gaussian_filter.1
= control target key start
LH: loop header
LB: loop body
LE: loop exit
PB: predicated region body
PF: predicated region fallthrough
CT: control target
= control target key end

     0   :  { %8 = vsyncpa [#allocation3], 0  ;;  %s1477_s0 = inlined_call_operand.hbm [shape: f32[16,16], index: 0, kind: input, shape index: {}]   ;;  %s1478_s1 = inlined_call_operand.hbm [shape: f32[16,16], index: 1, kind: input, shape index: {}]   ;;  %s1479_s2 = inlined_call_operand.hbm [shape: f32[6,16,16], index: 2, kind: input, shape index: {}]   ;;  %s1480_s3 = inlined_call_operand.hbm [shape: f32[6,16,16], index: 3, kind: output, shape index: {}]  }
   0x1   :  { %9 = vsyncpa [#allocation6], 0 }
   0x2   :  { %10 = vsyncpa [#allocation4], 0 }
   0x3   :  { %12 = vsyncpa [#allocation4 + $0x1], 0  ;;  %s1214_s12 = smov 0   ;;  %s1216_s13 = smov 0  }
   0x4   :  { %s1218_s14 = smov 0   ;;  %s1220_s15 = smov 0  }
   0x5 LB: > { %s1235_s16 = sadd.s32 4294967295, %s1184_s15   ;;  %s821_s17 = sadd.s32 4294967294, %s1184_s15   ;;  %s1184_s15 = sphi %s1220_s15, %s1508_s15   ;;  %s1180_s14 = sphi %s1218_s14, %s1507_s14   ;;  %s1176_s13 = sphi %s1216_s13, %s1506_s13   ;;  %s1172_s12 = sphi %s1214_s12, %s1505_s12  }
   0x6   : > { %s1239_s18 = sadd.s32 1, %s1184_s15   ;;  %s67_s19 = sadd.s32 1, %s1180_s14 }
   0x7   : > { %s64_s20 = ssub.s32 %s1184_s15, %s1239_s18  ;;  %p74_p0 = scmp.ne.s32.totalorder %s1180_s14, %s1176_s13 }
   0x8   : > { %p65_p1 = scmp.eq.s32.totalorder %s64_s20, 0  ;;  %p75_p2 = scmp.eq.s32.totalorder %s1184_s15, 0 }
   0x9   : > { %p80_p3 = scmp.ne.s32.totalorder %s1176_s13, %s1172_s12  ;;  %p1481_p4 = scmp.eq.s32.totalorder %s1235_s16, 0 }
   0xa   : > { %s1251_s21 = scalar_select %p65_p1, %s1180_s14, %s67_s19  }
   0xb   : > { %p1253_p5 = por %p75_p2, %p74_p0  ;;  %p1259_p6 = por %p1481_p4, %p80_p3 }
   0xc   : > { %p104_p7 = scmp.eq.s32.totalorder %s1235_s16, 1  ;;  %p110_p8 = scmp.eq.s32.totalorder %s821_s17, 1 }
   0xd   : > { %s1486_s22 = scalar_select %p1253_p5, 1, 0 }
   0xe   : > { %s1487_s23 = scalar_select %p1259_p6, 1, 0 }
   0xf   : > { %p822_p9 = scmp.ge.s32.totalorder %s1184_s15, 1  ;;  %p117_p10 = scmp.lt.s32.totalorder %s1184_s15, 3 }
  0x10   : > { %p1266_p11 = por %p104_p7, %p74_p0  ;;  %p1270_p12 = por %p110_p8, %p80_p3 }
  0x11   : > { %p1274_p13 = pnand %p822_p9, %p117_p10  ;;  %s1186_s27 = smov [#allocation2]  }
  0x12   : > { %s1488_s24 = scalar_select %p1266_p11, 1, 0 }
  0x13   : > { %s1489_s25 = scalar_select %p1270_p12, 1, 0 }
  0x14   : > { %s1490_s26 = scalar_select %p1274_p13, 1, 0 }
  0x15   : > { %p965_p1 = pneg %p1274_p13  ;;  %s129_s28 = sshll.u32 %s1186_s27, 4  ;;  %s130_s28 = int_to_ptr.vmem [resolvable:$true] %s129_s28 }
  0x16   : > { %s1187_s30 = smov [#allocation5]   ;;  %s1024_s7 = scalar_lea.hbm %s1477_s0, 256 }
  0x17   : > { %p1282_p2 = pnand %p965_p1, %p1481_p4  ;;  %s142_s4 = sshll.u32 %s1187_s30, 4  ;;  %s143_s4 = int_to_ptr.vmem [resolvable:$true] %s142_s4 }
  0x18   : > { %p1025_p7 = scmp.ne.s32.totalorder %s1477_s0, %s1024_s7  ;;  %p1031_p1 = scmp.lt.u32.totalorder %s1024_s7, %s1477_s0 }
  0x19   : > { %p1026_p8 = pneg %p1282_p2 }
  0x1b   : > { %p1027_p9 = pnand %p1026_p8, %p1025_p7 }
  0x1d   : > { %p1028_p10 = pneg %p1027_p9 }
  0x1f   : > { %p1033_p0 = pnand %p1031_p1, %p1028_p10 }
  0x21   : > { %1036 = shalt.err (!%p1033_p0)
}
  0x22   : > { %s1037_s17 = scalar_lea.vmem %s130_s28, 256  ;;  %p1045_p11 = scmp.lt.s32.totalorder %s130_s28, %s130_s28 }
  0x23   : > { %p1038_p4 = scmp.ne.s32.totalorder %s130_s28, %s1037_s17  ;;  %p1046_p6 = scmp.lt.s32.totalorder %s1037_s17, %s1037_s17 }
  0x25   : > { %p1040_p3 = pnand %p1038_p4, %p1026_p8  ;;  %p1047_p13 = por %p1046_p6, %p1045_p11 }
  0x27   : > { %p1041_p12 = pneg %p1040_p3 }
  0x29   : > { %p1048_p5 = pnand %p1047_p13, %p1041_p12 }
  0x2b   : > { %1051 = shalt.err (!%p1048_p5)
}
  0x2c   : > { %s1188_s19 = smov 128   ;;  %s1189_s20 = smov 8  }
  0x2d   : > { %968 = dma.hbm_to_vmem [thread:$0]  (!%p1282_p2), %s1477_s0, 256, %s130_s28, [#allocation3], %s1188_s19, %s1188_s19, %s1189_s20  }
  0x2e   : > { %p1492_p4 = scmp.ne.s32.totalorder %s1486_s22, 0  ;;  %p1493_p0 = scmp.lt.s32.totalorder %s1184_s15, 2 }
  0x2f   : > { %s1052_s8 = scalar_lea.hbm %s1478_s1, 256 }
  0x30   : > { %p1317_p3 = pnand %p1493_p0, %p1492_p4  ;;  %p1053_p5 = scmp.ne.s32.totalorder %s1478_s1, %s1052_s8 }
  0x31   : > { %p1059_p12 = scmp.lt.u32.totalorder %s1052_s8, %s1478_s1 }
  0x32   : > { %s1494_s5 = scalar_select %p1317_p3, 1, 0 }
  0x33   : > { %p1055_p6 = pnand %p1053_p5, %p1026_p8 }
  0x35   : > { %p1056_p11 = pneg %p1055_p6 }
  0x37   : > { %p1061_p13 = pnand %p1059_p12, %p1056_p11 }
  0x39   : > { %1064 = shalt.err (!%p1061_p13)
}
  0x3a   : > { %s1065_s11 = scalar_lea.vmem %s143_s4, 256  ;;  %p1073_p1 = scmp.lt.s32.totalorder %s143_s4, %s143_s4 }
  0x3b   : > { %p1066_p7 = scmp.ne.s32.totalorder %s143_s4, %s1065_s11  ;;  %p1074_p4 = scmp.lt.s32.totalorder %s1065_s11, %s1065_s11 }
  0x3d   : > { %p1068_p9 = pnand %p1066_p7, %p1026_p8  ;;  %p1075_p0 = por %p1074_p4, %p1073_p1 }
  0x3f   : > { %p1069_p10 = pneg %p1068_p9 }
  0x41   : > { %p1076_p3 = pnand %p1075_p0, %p1069_p10 }
  0x43   : > { %1079 = shalt.err (!%p1076_p3)
}
  0x44   : > { %971 = dma.hbm_to_vmem [thread:$0]  (!%p1282_p2), %s1478_s1, 256, %s143_s4, [#allocation6], %s1188_s19, %s1188_s19, %s1189_s20  }
  0x45   : > { %s156_s30 = sand.u32 1, %s1184_s15   ;;  %s158_s6 = sand.u32 1, %s1180_s14  }
  0x46   : > { %s951_s7 = smul.u32 48, %s158_s6  ;;  %s1354_s11 = scalar_lea.sflag [#allocation3], %s156_s30 }
  0x47   : > { %s859_s8 = smul.u32 768, %s1184_s15  ;;  %p1495_p8 = scmp.ne.s32.totalorder %s1494_s5, 0 }
  0x48   : > { %s160_s28 = scalar_lea.vmem [#allocation7], %s951_s7  ;;  %s1085_s6 = scalar_lea.hbm %s1479_s2, 1536 }
  0x49   : > { %s1350_s29 = scalar_lea.hbm %s1479_s2, %s859_s8  ;;  %s168_s22 = sshll.u32 %s160_s28, 4  ;;  %s1352_s22 = int_to_ptr.vmem [resolvable:$true] %s168_s22 }
  0x4a   : > { %s1080_s4 = scalar_lea.hbm %s1350_s29, 768  ;;  %p1082_p3 = pneg %p1495_p8 }
  0x4b   : > { %p1081_p2 = scmp.ne.s32.totalorder %s1350_s29, %s1080_s4  ;;  %p1086_p11 = scmp.lt.u32.totalorder %s1350_s29, %s1479_s2 }
  0x4c   : > { %p1087_p12 = scmp.lt.u32.totalorder %s1085_s6, %s1080_s4  ;;  %p1089_p7 = scmp.lt.u32.totalorder %s1080_s4, %s1350_s29 }
  0x4d   : > { %p1083_p5 = pnand %p1082_p3, %p1081_p2 }
  0x4e   : > { %p1088_p13 = por %p1087_p12, %p1086_p11 }
  0x4f   : > { %p1084_p6 = pneg %p1083_p5 }
  0x50   : > { %p1090_p9 = por %p1089_p7, %p1088_p13 }
  0x52   : > { %p1091_p10 = pnand %p1090_p9, %p1084_p6 }
  0x54   : > { %1094 = shalt.err (!%p1091_p10)
}
  0x55   : > { %s1095_s30 = scalar_lea.vmem %s1352_s22, 768  ;;  %s1190_s7 = smov [#allocation7]  }
  0x56   : > { %p1096_p1 = scmp.ne.s32.totalorder %s1352_s22, %s1095_s30  ;;  %s1100_s10 = sshll.u32 %s1190_s7, 4  ;;  %s1101_s10 = int_to_ptr.vmem [resolvable:$false] %s1100_s10 }
  0x57   : > { %s1102_s28 = scalar_lea.vmem %s1101_s10, 1536  ;;  %p1103_p2 = scmp.lt.s32.totalorder %s1352_s22, %s1101_s10 }
  0x58   : > { %p1098_p4 = pnand %p1096_p1, %p1082_p3  ;;  %p1104_p5 = scmp.lt.s32.totalorder %s1102_s28, %s1095_s30 }
  0x5a   : > { %p1099_p0 = pneg %p1098_p4  ;;  %p1105_p11 = por %p1104_p5, %p1103_p2 }
  0x5c   : > { %p1106_p12 = pnand %p1105_p11, %p1099_p0 }
  0x5e   : > { %1109 = shalt.err (!%p1106_p12)
}
  0x5f   : > { %975 = dma.hbm_to_vmem [thread:$0]  (!%p1495_p8), %s1350_s29, 768, %s1352_s22, %s1354_s11, %s1188_s19, %s1188_s19, %s1189_s20  }
  0x60   : > { %p1496_p3 = scmp.ne.s32.totalorder %s1490_s26, 0 }
  0x61   : > { %p1497_p6 = scmp.eq.s32.totalorder (!%p1496_p3), %s1235_s16, 0 }
  0x62   : > { %180 = sbr.rel (%p1496_p3) target bundleno = 571 (0x23b), region = 32 }
  0x69   : > { %1155 = dma.done.wait (%p1497_p6), [#allocation3], 256   ;;  %p1498_p13 = pmov %p1497_p6 }
  0x6a   : > { %p1499_p7 = pmov %p1497_p6 }
  0x6b   : > { %1157 = vsyncadd (%p1498_p13), [#allocation3], 4294967040 }
  0x6c   : > { %1159 = dma.done.wait (%p1499_p7), [#allocation6], 256   ;;  %p1500_p9 = pmov %p1497_p6 }
  0x6d   : > { %s190_s19 = sand.u32 1, %s1235_s16   ;;  %s192_s20 = sand.u32 1, %s1176_s13  }
  0x6e   : > { %1161 = vsyncadd (%p1500_p9), [#allocation6], 4294967040  ;;  %s1399_s26 = smul.u32 48, %s192_s20  ;;  %s191_s5 = scalar_lea.sflag [#allocation3], %s190_s19 }
  0x6f   : > { %p1501_p8 = scmp.ne.s32.totalorder %s1487_s23, 0 }
  0x70   : > { %s194_s29 = scalar_lea.vmem [#allocation7], %s1399_s26 }
  0x71   : > { %1163 = dma.done.wait (%p1501_p8), %s191_s5, 768  }
  0x72   : > { %1165 = vsyncadd (%p1501_p8), %s191_s5, 4294966528  ;;  %vm225_vm0 = vcmask 130048   ;;  %v223_v0 = vld [vmem:[%s194_s29] sm:$0xff]  ;;  %v224_v1 = vld [vmem:[%s194_s29 + $0x8] sm:$0xff]  ;;  %s216_s23 = scalar_lea.vmem [#allocation8], %s1399_s26  ;;  %s860_s11 = smul.u32 768, %s1235_s16 }
  0x73   : > { %v219_v2 = vld [vmem:[#allocation2] sm:$0xff]  ;;  %v927_v3 = vpack.c.bf16 %v224_v1, %v223_v0  ;;  %v836_v5 = vld [vmem:[%s194_s29 + $0x18] sm:$0xff]  ;;  %v844_v8 = vld [vmem:[%s194_s29 + $0x28] sm:$0xff]  ;;  %s729_s22 = sshll.u32 %s216_s23, 4  ;;  %s1435_s16 = scalar_lea.sflag [#allocation4], %s192_s20  ;;  %s1423_s22 = int_to_ptr.vmem [resolvable:$true] %s729_s22 }
  0x74   : > { %889 = vmatprep.mubr.msk.f32.mxu0 %vm225_vm0, %v219_v2  ;;  %v835_v4 = vld [vmem:[%s194_s29 + $0x10] sm:$0xff]  ;;  %v843_v7 = vld [vmem:[%s194_s29 + $0x20] sm:$0xff]  ;;  %v222_v10 = vld [vmem:[#allocation5 + $0x8] sm:$0xff]  ;;  %s1429_s27 = scalar_lea.hbm %s1480_s3, %s860_s11  ;;  %s1110_s6 = scalar_lea.vmem %s1423_s22, 768 }
  0x75   : > { %v935_v6 = vpack.c.bf16 %v836_v5, %v835_v4  ;;  %v221_v9 = vld [vmem:[#allocation5] sm:$0xff]  ;;  %928 = vmatprep.subr.bf16.mxu0 %v927_v3  ;;  %v220_v11 = vld [vmem:[#allocation2 + $0x8] sm:$0xff]  ;;  %v943_v13 = vpack.c.bf16 %v844_v8, %v843_v7  ;;  %p1111_p10 = scmp.ne.s32.totalorder %s1423_s22, %s1110_s6  ;;  %p1502_p1 = scmp.ne.s32.totalorder %s1488_s24, 0 }
  0x76   : > { %930 = vmatpush3.bf16.msra.mxu0 %v927_v3  ;;  %v931_v12 = vpack.c.bf16 %v222_v10, %v221_v9  ;;  %s1191_s8 = smov [#allocation8]  }
  0x77   : > { %936 = vmatprep.subr.bf16.mxu0 %v935_v6  ;;  %p1112_p4 = pnand %p1111_p10, %p1502_p1  ;;  %s1114_s9 = sshll.u32 %s1191_s8, 4  ;;  %s1115_s9 = int_to_ptr.vmem [resolvable:$false] %s1114_s9 }
  0x78   : > { %932 = vmatprep.subr.bf16.mxu1 %v931_v12  ;;  %s1116_s30 = scalar_lea.vmem %s1115_s9, 1536  ;;  %p1117_p2 = scmp.lt.s32.totalorder %s1423_s22, %s1115_s9 }
  0x79   : > { %890 = vmatmul.mubr.msk.f32.vlgmr.msra.gmra.mrb[0].mxu0 %vm225_vm0, %v220_v11  ;;  %934 = vmatpush3.bf16.msra.mxu1 %v931_v12  ;;  %p1113_p0 = pneg %p1112_p4  ;;  %p1118_p5 = scmp.lt.s32.totalorder %s1116_s30, %s1110_s6 }
  0x7a   : > { %938 = vmatpush3.bf16.msra.mxu0 %v935_v6  ;;  %903 = vmatprep.mubr.msk.f32.mxu0 %vm225_vm0, %v219_v2 }
  0x7b   : > { %944 = vmatprep.subr.bf16.mxu0 %v943_v13  ;;  %940 = vmatprep.subr.bf16.mxu1 %v931_v12  ;;  %p1119_p11 = por %p1118_p5, %p1117_p2 }
  0x7d   : > { %904 = vmatmul.mubr.msk.f32.vlgmr.msra.gmra.mrb[2].mxu0 %vm225_vm0, %v220_v11  ;;  %p1120_p12 = pnand %p1119_p11, %p1113_p0 }
  0x7e   : > { %946 = vmatpush3.bf16.msra.mxu0 %v943_v13  ;;  %917 = vmatprep.mubr.msk.f32.mxu0 %vm225_vm0, %v219_v2 }
  0x81   : > { %918 = vmatmul.mubr.msk.f32.vlgmr.msra.gmra.mrb[4].mxu0 %vm225_vm0, %v220_v11 }
 0x14c   : > { %v891_v14 = vpop.f32.mrb[0].mxu0 }
 0x14d   : > { %v298_v15 = vpop.f32.mrb[1].mxu0 }
 0x14e   : > { %896 = vmatprep.mubr.msk.f32.mxu1 %vm225_vm0, %v298_v15 }
 0x14f   : > { %897 = vmatmul.mubr.msk.f32.vlgmr.msra.gmra.mrb[0].mxu1 %vm225_vm0, %v891_v14 }
 0x150   : > { %v905_v16 = vpop.f32.mrb[2].mxu0  ;;  %942 = vmatpush3.bf16.msra.mxu1 %v931_v12 }
 0x151   : > { %v459_v17 = vpop.f32.mrb[3].mxu0  ;;  %948 = vmatprep.subr.bf16.mxu1 %v931_v12 }
 0x152   : > { %910 = vmatprep.mubr.msk.f32.mxu1 %vm225_vm0, %v459_v17 }
 0x153   : > { %911 = vmatmul.mubr.msk.f32.vlgmr.msra.gmra.mrb[2].mxu1 %vm225_vm0, %v905_v16 }
 0x154   : > { %v919_v18 = vpop.f32.mrb[4].mxu0  ;;  %950 = vmatpush3.bf16.msra.mxu1 %v931_v12 }
 0x155   : > { %v621_v19 = vpop.f32.mrb[5].mxu0 }
 0x156   : > { %924 = vmatprep.mubr.msk.f32.mxu1 %vm225_vm0, %v621_v19 }
 0x157   : > { %925 = vmatmul.mubr.msk.f32.vlgmr.msra.gmra.mrb[4].mxu1 %vm225_vm0, %v919_v18 }
 0x222   : > { %v898_v20 = vpop.f32.mrb[0].mxu1 }
 0x223   : > { %389 = vst.msk [vmem:[%s216_s23 + $0x8] sm:$0xff] %vm225_vm0, %v898_v20  ;;  %v379_v21 = vpop.f32.mrb[1].mxu1 }
 0x224   : > { %388 = vst.msk [vmem:[%s216_s23] sm:$0xff] %vm225_vm0, %v379_v21 }
 0x226   : > { %v912_v22 = vpop.f32.mrb[2].mxu1 }
 0x227   : > { %842 = vst.msk [vmem:[%s216_s23 + $0x18] sm:$0xff] %vm225_vm0, %v912_v22  ;;  %v540_v23 = vpop.f32.mrb[3].mxu1 }
 0x228   : > { %841 = vst.msk [vmem:[%s216_s23 + $0x10] sm:$0xff] %vm225_vm0, %v540_v23 }
 0x22a   : > { %v926_v24 = vpop.f32.mrb[4].mxu1 }
 0x22b   : > { %850 = vst.msk [vmem:[%s216_s23 + $0x28] sm:$0xff] %vm225_vm0, %v926_v24  ;;  %v702_v25 = vpop.f32.mrb[5].mxu1 }
 0x22c   : > { %849 = vst.msk [vmem:[%s216_s23 + $0x20] sm:$0xff] %vm225_vm0, %v702_v25 }
 0x22d   : > { %1123 = shalt.err (!%p1120_p12)
}
 0x22e   : > { %s1124_s7 = scalar_lea.hbm %s1429_s27, 768  ;;  %s1128_s19 = scalar_lea.hbm %s1480_s3, 1536 }
 0x22f   : > { %p1125_p3 = scmp.ne.s32.totalorder %s1429_s27, %s1124_s7  ;;  %p1129_p7 = scmp.lt.u32.totalorder %s1429_s27, %s1480_s3 }
 0x230   : > { %p1130_p9 = scmp.lt.u32.totalorder %s1128_s19, %s1124_s7  ;;  %p1132_p10 = scmp.lt.u32.totalorder %s1124_s7, %s1429_s27 }
 0x231   : > { %p1126_p6 = pnand %p1125_p3, %p1502_p1 }
 0x232   : > { %p1131_p8 = por %p1130_p9, %p1129_p7 }
 0x233   : > { %p1127_p13 = pneg %p1126_p6 }
 0x234   : > { %p1133_p4 = por %p1132_p10, %p1131_p8 }
 0x236   : > { %p1134_p0 = pnand %p1133_p4, %p1127_p13 }
 0x238   : > { %1137 = shalt.err (!%p1134_p0)
}
 0x239   : > { %s1192_s5 = smov 128   ;;  %s1193_s29 = smov 8  }
 0x23a   : > { %963 = dma.vmem_to_hbm [thread:$0]  (%p1502_p1), %s1423_s22, 768, %s1429_s27, %s1435_s16, %s1192_s5, %s1192_s5, %s1193_s29  }
 0x23b PF: > { %s744_s23 = sand.u32 1, %s1172_s12   ;;  %p1503_p2 = scmp.ne.s32.totalorder %s1489_s25, 0 }
 0x23c   : > { %p1504_p5 = scmp.ge.s32.totalorder %s1184_s15, 2  ;;  %s745_s11 = scalar_lea.sflag [#allocation4], %s744_s23 }
 0x23e   : > { %p977_p11 = pnand %p1504_p5, %p1503_p2 }
 0x240   : > { %1167 = dma.done.wait (!%p977_p11), %s745_s11, 768  }
 0x241   : > { %1169 = vsyncadd (!%p977_p11), %s745_s11, 4294966528  ;;  %p15_p12 = scmp.ge.s32.totalorder %s1239_s18, 4   ;;  %s1505_s12 = smov %s1176_s13 }
 0x242   : > { %s1506_s13 = smov %s1180_s14  ;;  %s1507_s14 = smov %s1251_s21 }
 0x243   : > { %s1508_s15 = smov %s1239_s18  ;;  %17 = sbr.rel (!%p15_p12) target bundleno = 5 (0x5), region = 88 }
 0x24a   :  { %750 = vsyncpa [#allocation3], 1 }
 0x24b   :  { %752 = vsyncpa [#allocation3 + $0x1], 1 }
 0x24c   :  { %753 = vsyncpa [#allocation6], 1 }
 0x24d   :  { %754 = vsyncpa [#allocation4], 1 }
 0x24e   :  { %756 = vsyncpa [#allocation4 + $0x1], 1 }

</bundles_post_ra>
